<compile_context>
chip_gen: v7x
topology: tpu7x:2x2x1
jax: 0.10.0
libtpu: 0.0.40
codegen_flags: <defaults>
</compile_context>

<pallas_src>
import functools

import jax
import jax.numpy as jnp
import numpy as np
from jax.experimental import pallas as pl
from jax.experimental.pallas import tpu as pltpu

EPS = 1e-5  # PyTorch nn.LayerNorm default


# ---------------------------------------------------------------------------
# Pass 1: LayerNorm + Q/K/V projections (computed once per sequence row)
# ---------------------------------------------------------------------------
def qkv_kernel(x_ref, gamma_ref, beta_ref, wq_ref, wk_ref, wv_ref,
               q_ref, k_ref, v_ref):
    x = x_ref[0]                                           # (T, D) f32
    mean = jnp.mean(x, axis=-1, keepdims=True)
    xc = x - mean
    var = jnp.mean(xc * xc, axis=-1, keepdims=True)        # biased, like nn.LayerNorm
    ln = (xc * jax.lax.rsqrt(var + EPS) * gamma_ref[0] + beta_ref[0]
          ).astype(jnp.bfloat16)

    # bf16 operands, f32 MXU accumulation; stored bf16 (halves HBM/VMEM bytes).
    q_ref[0] = jnp.dot(ln, wq_ref[...],
                       preferred_element_type=jnp.float32).astype(jnp.bfloat16)
    k_ref[0] = jnp.dot(ln, wk_ref[...],
                       preferred_element_type=jnp.float32).astype(jnp.bfloat16)
    v_ref[0] = jnp.dot(ln, wv_ref[...],
                       preferred_element_type=jnp.float32).astype(jnp.bfloat16)


# ---------------------------------------------------------------------------
# Pass 2: attention (softmax over full keys) + MLP(Swish) + residual, per Q tile
# ---------------------------------------------------------------------------
def attn_mlp_kernel(x_ref, q_ref, k_ref, v_ref,
                    w1_ref, b1_ref, w2_ref, b2_ref, out_ref,
                    *, seq_len, seq_pad):
    q = q_ref[0]                                           # (TQ, D)   bf16
    k = k_ref[0]                                           # (Spad, D) bf16

    # Q @ K^T by contracting the feature dims directly (no XLU transpose copy).
    scores = jax.lax.dot_general(
        q, k, dimension_numbers=(((1,), (1,)), ((), ())),
        preferred_element_type=jnp.float32)                # (TQ, Spad) f32

    if seq_pad != seq_len:  # static: mask zero-padded key columns
        key_idx = jax.lax.broadcasted_iota(jnp.int32, scores.shape, 1)
        scores = jnp.where(key_idx < seq_len, scores, -jnp.inf)

    scores = scores - jnp.max(scores, axis=-1, keepdims=True)
    e = jnp.exp(scores)
    inv_denom = pl.reciprocal(jnp.sum(e, axis=-1, keepdims=True), approx=True)
    attn = (e * inv_denom).astype(jnp.bfloat16)            # (TQ, Spad)

    # 1/sqrt(dim_k) is already folded into Wv (see init_params).
    a = jnp.dot(attn, v_ref[0], preferred_element_type=jnp.float32)   # (TQ, D)

    # TODO(synk): nn.Dropout layers are identity in eval mode; training-mode
    # random dropout masks are not implemented here.

    # MLP: Linear(D, 4D) -> Swish -> Linear(4D, D); Swish kept in f32 (v5e-safe).
    h = jnp.dot(a.astype(jnp.bfloat16), w1_ref[...],
                preferred_element_type=jnp.float32) + b1_ref[0]        # (TQ, 4D)
    h = h * jax.nn.sigmoid(h)
    m = jnp.dot(h.astype(jnp.bfloat16), w2_ref[...],
                preferred_element_type=jnp.float32) + b2_ref[0]        # (TQ, D)

    # Residual uses the pre-LayerNorm input of this query tile.
    out_ref[0] = m + x_ref[0]


# ---------------------------------------------------------------------------
# Wrapper helpers
# ---------------------------------------------------------------------------
def _default_max_tile():
    """256 fills the v6e/v7x 256x256 MXU; 128 is native on v5e's 128x128 MXU."""
    try:
        kind = jax.devices()[0].device_kind.lower()
    except Exception:
        return 128
    if "v5 lite" in kind or "v5e" in kind or "v5lite" in kind:
        return 128
    return 256


def _vmem_limit_bytes():
    """~78% of physical VMEM, capped at 100 MiB (headroom for compiler scratch)."""
    try:
        cap = int(pltpu.get_tpu_info().vmem_capacity_bytes)
    except Exception:
        cap = 64 * 1024 * 1024
    return max(32 * 1024 * 1024, min(int(cap * 0.78), 100 * 1024 * 1024))


def _choose_tiles(seq_len, max_tile):
    """Return (query_tile, padded_seq). Pads to a multiple of 128 when needed."""
    if seq_len <= max_tile:
        return seq_len, seq_len
    seq_pad = ((seq_len + 127) // 128) * 128
    tq = max_tile if seq_pad % max_tile == 0 else 128
    return tq, seq_pad


def _const_spec(shape, single_buffer):
    """BlockSpec for a block whose index never changes (weights / biases)."""
    idx = lambda b, i: tuple(0 for _ in shape)
    if single_buffer:
        return pl.BlockSpec(shape, idx, pipeline_mode=pl.Buffered(1))
    return pl.BlockSpec(shape, idx)


def _encoder_block_impl(x, params, *, q_tile, single_buffer_weights):
    B, S, D = x.shape
    H = params["w1"].shape[1]
    max_tile = q_tile if q_tile is not None else _default_max_tile()
    TQ, S_pad = _choose_tiles(S, max_tile)
    nq = S_pad // TQ

    x_p = x if S_pad == S else jnp.pad(x, ((0, 0), (0, S_pad - S), (0, 0)))

    cp = pltpu.CompilerParams(
        dimension_semantics=("parallel", "parallel"),
        vmem_limit_bytes=_vmem_limit_bytes(),
    )
    const = lambda shape: _const_spec(shape, single_buffer_weights)
    tile_spec = pl.BlockSpec((1, TQ, D), lambda b, i: (b, i, 0))
    full_spec = pl.BlockSpec((1, S_pad, D), lambda b, i: (b, 0, 0))

    # ---- pass 1: LN + Q/K/V (once per row, not once per query tile) ----
    q, k, v = pl.pallas_call(
        qkv_kernel,
        out_shape=tuple(jax.ShapeDtypeStruct((B, S_pad, D), jnp.bfloat16)
                        for _ in range(3)),
        grid_spec=pltpu.PrefetchScalarGridSpec(
            num_scalar_prefetch=0,
            grid=(B, nq),
            in_specs=[
                tile_spec,          # x tile (f32)
                const((1, D)),      # gamma
                const((1, D)),      # beta
                const((D, D)),      # Wq^T  (bf16)
                const((D, D)),      # Wk^T  (bf16)
                const((D, D)),      # Wv^T  (bf16, 1/sqrt(d) pre-folded)
            ],
            out_specs=[tile_spec, tile_spec, tile_spec],
        ),
        compiler_params=cp,
    )(x_p, params["gamma"], params["beta"],
      params["wq"], params["wk"], params["wv"])

    # ---- pass 2: attention + MLP + residual per query tile ----
    kern = functools.partial(attn_mlp_kernel, seq_len=S, seq_pad=S_pad)
    out = pl.pallas_call(
        kern,
        out_shape=jax.ShapeDtypeStruct((B, S_pad, D), jnp.float32),
        grid_spec=pltpu.PrefetchScalarGridSpec(
            num_scalar_prefetch=0,
            grid=(B, nq),
            in_specs=[
                tile_spec,          # x tile (f32, residual)
                tile_spec,          # Q tile (bf16)
                full_spec,          # K full seq (bf16)
                full_spec,          # V full seq (bf16)
                const((D, H)),      # W1^T (bf16)
                const((1, H)),      # b1
                const((H, D)),      # W2^T (bf16)
                const((1, D)),      # b2
            ],
            out_specs=tile_spec,
        ),
        compiler_params=cp,
    )(x_p, q, k, v, params["w1"], params["b1"], params["w2"], params["b2"])

    return out if S_pad == S else out[:, :S, :]


def encoder_block(x, params, *, q_tile=None):
    try:
        return _encoder_block_impl(x, params, q_tile=q_tile,
                                   single_buffer_weights=True)
    except Exception:
        # pipeline_mode=pl.Buffered(1) not supported by this jax version ->
        # fall back to default double-buffered weight blocks.
        return _encoder_block_impl(x, params, q_tile=q_tile,
                                   single_buffer_weights=False)


# ---------------------------------------------------------------------------
# Parameters + pure-JAX reference
# ---------------------------------------------------------------------------
def init_params(key, d_model):
    hidden = 4 * d_model
    ks = jax.random.split(key, 8)
    scale = 1.0 / np.sqrt(d_model)
    norm_fact = 1.0 / np.sqrt(d_model)  # SelfAttention._norm_fact (dim_k = d_model)
    return {
        "gamma": jnp.ones((1, d_model), jnp.float32),
        "beta": jnp.zeros((1, d_model), jnp.float32),
        # Projection weights stored as (in, out) == W^T of the PyTorch nn.Linear
        # weights, in bf16 for MXU throughput / halved DMA bytes.
        "wq": (jax.random.normal(ks[0], (d_model, d_model)) * scale
               ).astype(jnp.bfloat16),
        "wk": (jax.random.normal(ks[1], (d_model, d_model)) * scale
               ).astype(jnp.bfloat16),
        # Attention's 1/sqrt(dim_k) is folded into Wv once, host-side:
        #   (softmax(QK^T) * c) @ (x_ln Wv) == softmax(QK^T) @ (x_ln (Wv * c)).
        "wv": (jax.random.normal(ks[2], (d_model, d_model)) * scale * norm_fact
               ).astype(jnp.bfloat16),
        "w1": (jax.random.normal(ks[3], (d_model, hidden)) * scale
               ).astype(jnp.bfloat16),
        "b1": (jax.random.normal(ks[4], (1, hidden)) * 0.02).astype(jnp.float32),
        "w2": (jax.random.normal(ks[5], (hidden, d_model)) / np.sqrt(hidden)
               ).astype(jnp.bfloat16),
        "b2": (jax.random.normal(ks[6], (1, d_model)) * 0.02).astype(jnp.float32),
    }


def encoder_block_ref(x, p):
    """Pure-JAX f32 reference of the PyTorch forward (eval mode).

    The attention 1/sqrt(dim_k) factor is pre-folded into p['wv'], which is
    mathematically identical to PyTorch's softmax(Q K^T) * norm_fact @ V.
    """
    wq = p["wq"].astype(jnp.float32)
    wk = p["wk"].astype(jnp.float32)
    wv = p["wv"].astype(jnp.float32)
    w1 = p["w1"].astype(jnp.float32)
    w2 = p["w2"].astype(jnp.float32)
    mean = jnp.mean(x, axis=-1, keepdims=True)
    var = jnp.mean((x - mean) ** 2, axis=-1, keepdims=True)
    x_ln = (x - mean) / jnp.sqrt(var + EPS) * p["gamma"][0] + p["beta"][0]
    q = x_ln @ wq
    k = x_ln @ wk
    v = x_ln @ wv
    scores = jnp.einsum("bqd,bkd->bqk", q, k)
    attn = jax.nn.softmax(scores, axis=-1)
    a = jnp.einsum("bqk,bkd->bqd", attn, v)
    h = a @ w1 + p["b1"][0]
    h = h * jax.nn.sigmoid(h)
    m = h @ w2 + p["b2"][0]
    return m + x


if __name__ == "__main__":
    B, S, D = 2, 8, 32
    key = jax.random.PRNGKey(0)
    kx, kp = jax.random.split(key)
    x = jax.random.normal(kx, (B, S, D), dtype=jnp.float32)
    params = init_params(kp, D)

    out = jax.block_until_ready(encoder_block(x, params))

    ref = encoder_block_ref(x, params)
    # bf16 MXU operands + EUP approximate reciprocal => loosened tolerance
    # (the f32 reference uses the same bf16-quantized weights upcast to f32).
    np.testing.assert_allclose(np.asarray(out), np.asarray(ref),
                               rtol=3e-2, atol=3e-2)
    print("KERNEL_OK")
</pallas_src>

<mosaic_0001>
module attributes {stable_mosaic.version = 11 : i64} {
  func.func @qkv_kernel(%arg0: i32, %arg1: i32, %arg2: memref<1x8x32xf32, #tpu.memory_space<vmem>>, %arg3: memref<1x32xf32, #tpu.memory_space<vmem>>, %arg4: memref<1x32xf32, #tpu.memory_space<vmem>>, %arg5: memref<32x32xbf16, #tpu.memory_space<vmem>>, %arg6: memref<32x32xbf16, #tpu.memory_space<vmem>>, %arg7: memref<32x32xbf16, #tpu.memory_space<vmem>>, %arg8: memref<1x8x32xbf16, #tpu.memory_space<vmem>>, %arg9: memref<1x8x32xbf16, #tpu.memory_space<vmem>>, %arg10: memref<1x8x32xbf16, #tpu.memory_space<vmem>>) attributes {dimension_semantics = [#tpu.dimension_semantics<parallel>, #tpu.dimension_semantics<parallel>], iteration_bounds = array<i64: 2, 1>, scalar_prefetch = 0 : i64, scratch_operands = 0 : i64, tpu.core_type = #tpu.core_type<tc>, window_params = [{transform_indices = @transform_0, window_bounds = array<i64: 1, 8, 32>}, {pipeline_mode = #tpu.pipeline_mode<synchronous>, transform_indices = @transform_1, window_bounds = array<i64: 1, 32>}, {pipeline_mode = #tpu.pipeline_mode<synchronous>, transform_indices = @transform_2, window_bounds = array<i64: 1, 32>}, {pipeline_mode = #tpu.pipeline_mode<synchronous>, transform_indices = @transform_3, window_bounds = array<i64: 32, 32>}, {pipeline_mode = #tpu.pipeline_mode<synchronous>, transform_indices = @transform_4, window_bounds = array<i64: 32, 32>}, {pipeline_mode = #tpu.pipeline_mode<synchronous>, transform_indices = @transform_5, window_bounds = array<i64: 32, 32>}, {transform_indices = @transform_6, window_bounds = array<i64: 1, 8, 32>}, {transform_indices = @transform_7, window_bounds = array<i64: 1, 8, 32>}, {transform_indices = @transform_8, window_bounds = array<i64: 1, 8, 32>}]} {
    %c0 = arith.constant 0 : index
    %c0_0 = arith.constant 0 : index
    %c0_1 = arith.constant 0 : index
    %0 = vector.load %arg2[%c0, %c0_0, %c0_1] : memref<1x8x32xf32, #tpu.memory_space<vmem>>, vector<1x8x32xf32>
    %1 = vector.shape_cast %0 : vector<1x8x32xf32> to vector<8x32xf32>
    %cst = arith.constant dense<0.000000e+00> : vector<8xf32>
    %2 = vector.multi_reduction <add>, %1, %cst [1] : vector<8x32xf32> to vector<8xf32>
    %3 = vector.shape_cast %2 : vector<8xf32> to vector<8x1xf32>
    %cst_2 = arith.constant 3.200000e+01 : f32
    %4 = vector.broadcast %cst_2 : f32 to vector<8x1xf32>
    %5 = arith.divf %3, %4 : vector<8x1xf32>
    %6 = vector.broadcast %5 : vector<8x1xf32> to vector<8x32xf32>
    %7 = arith.subf %1, %6 : vector<8x32xf32>
    %8 = arith.mulf %7, %7 : vector<8x32xf32>
    %cst_3 = arith.constant dense<0.000000e+00> : vector<8xf32>
    %9 = vector.multi_reduction <add>, %8, %cst_3 [1] : vector<8x32xf32> to vector<8xf32>
    %10 = vector.shape_cast %9 : vector<8xf32> to vector<8x1xf32>
    %cst_4 = arith.constant 3.200000e+01 : f32
    %11 = vector.broadcast %cst_4 : f32 to vector<8x1xf32>
    %12 = arith.divf %10, %11 : vector<8x1xf32>
    %cst_5 = arith.constant 9.99999974E-6 : f32
    %13 = vector.broadcast %cst_5 : f32 to vector<8x1xf32>
    %14 = arith.addf %12, %13 : vector<8x1xf32>
    %15 = math.rsqrt %14 : vector<8x1xf32>
    %16 = vector.broadcast %15 : vector<8x1xf32> to vector<8x32xf32>
    %17 = arith.mulf %7, %16 : vector<8x32xf32>
    %c0_6 = arith.constant 0 : index
    %c0_7 = arith.constant 0 : index
    %18 = vector.load %arg3[%c0_6, %c0_7] : memref<1x32xf32, #tpu.memory_space<vmem>>, vector<1x32xf32>
    %19 = vector.shape_cast %18 : vector<1x32xf32> to vector<32xf32>
    %20 = vector.shape_cast %19 : vector<32xf32> to vector<1x32xf32>
    %21 = vector.broadcast %20 : vector<1x32xf32> to vector<8x32xf32>
    %22 = arith.mulf %17, %21 : vector<8x32xf32>
    %c0_8 = arith.constant 0 : index
    %c0_9 = arith.constant 0 : index
    %23 = vector.load %arg4[%c0_8, %c0_9] : memref<1x32xf32, #tpu.memory_space<vmem>>, vector<1x32xf32>
    %24 = vector.shape_cast %23 : vector<1x32xf32> to vector<32xf32>
    %25 = vector.shape_cast %24 : vector<32xf32> to vector<1x32xf32>
    %26 = vector.broadcast %25 : vector<1x32xf32> to vector<8x32xf32>
    %27 = arith.addf %22, %26 : vector<8x32xf32>
    %28 = arith.truncf %27 : vector<8x32xf32> to vector<8x32xbf16>
    %c0_10 = arith.constant 0 : index
    %c0_11 = arith.constant 0 : index
    %29 = vector.load %arg5[%c0_10, %c0_11] : memref<32x32xbf16, #tpu.memory_space<vmem>>, vector<32x32xbf16>
    %cst_12 = arith.constant dense<0.000000e+00> : vector<8x32xf32>
    %30 = tpu.matmul %28, %29, %cst_12 {dimension_numbers = #tpu.dot_dimension_numbers<[1], [0], [0], [1], [0, 0, 1, 1], [], []>} : vector<8x32xbf16>, vector<32x32xbf16>, vector<8x32xf32> -> vector<8x32xf32>
    %31 = arith.truncf %30 : vector<8x32xf32> to vector<8x32xbf16>
    %c0_13 = arith.constant 0 : index
    %c0_14 = arith.constant 0 : index
    %c0_15 = arith.constant 0 : index
    %32 = vector.load %arg8[%c0_13, %c0_14, %c0_15] : memref<1x8x32xbf16, #tpu.memory_space<vmem>>, vector<1x8x32xbf16>
    %33 = vector.shape_cast %32 : vector<1x8x32xbf16> to vector<8x32xbf16>
    %34 = vector.shape_cast %31 : vector<8x32xbf16> to vector<1x8x32xbf16>
    tpu.vector_store %arg8[%c0_13, %c0_14, %c0_15], %34 {strides = array<i32>} : memref<1x8x32xbf16, #tpu.memory_space<vmem>>, vector<1x8x32xbf16>,
    %c0_16 = arith.constant 0 : index
    %c0_17 = arith.constant 0 : index
    %35 = vector.load %arg6[%c0_16, %c0_17] : memref<32x32xbf16, #tpu.memory_space<vmem>>, vector<32x32xbf16>
    %cst_18 = arith.constant dense<0.000000e+00> : vector<8x32xf32>
    %36 = tpu.matmul %28, %35, %cst_18 {dimension_numbers = #tpu.dot_dimension_numbers<[1], [0], [0], [1], [0, 0, 1, 1], [], []>} : vector<8x32xbf16>, vector<32x32xbf16>, vector<8x32xf32> -> vector<8x32xf32>
    %37 = arith.truncf %36 : vector<8x32xf32> to vector<8x32xbf16>
    %c0_19 = arith.constant 0 : index
    %c0_20 = arith.constant 0 : index
    %c0_21 = arith.constant 0 : index
    %38 = vector.load %arg9[%c0_19, %c0_20, %c0_21] : memref<1x8x32xbf16, #tpu.memory_space<vmem>>, vector<1x8x32xbf16>
    %39 = vector.shape_cast %38 : vector<1x8x32xbf16> to vector<8x32xbf16>
    %40 = vector.shape_cast %37 : vector<8x32xbf16> to vector<1x8x32xbf16>
    tpu.vector_store %arg9[%c0_19, %c0_20, %c0_21], %40 {strides = array<i32>} : memref<1x8x32xbf16, #tpu.memory_space<vmem>>, vector<1x8x32xbf16>,
    %c0_22 = arith.constant 0 : index
    %c0_23 = arith.constant 0 : index
    %41 = vector.load %arg7[%c0_22, %c0_23] : memref<32x32xbf16, #tpu.memory_space<vmem>>, vector<32x32xbf16>
    %cst_24 = arith.constant dense<0.000000e+00> : vector<8x32xf32>
    %42 = tpu.matmul %28, %41, %cst_24 {dimension_numbers = #tpu.dot_dimension_numbers<[1], [0], [0], [1], [0, 0, 1, 1], [], []>} : vector<8x32xbf16>, vector<32x32xbf16>, vector<8x32xf32> -> vector<8x32xf32>
    %43 = arith.truncf %42 : vector<8x32xf32> to vector<8x32xbf16>
    %c0_25 = arith.constant 0 : index
    %c0_26 = arith.constant 0 : index
    %c0_27 = arith.constant 0 : index
    %44 = vector.load %arg10[%c0_25, %c0_26, %c0_27] : memref<1x8x32xbf16, #tpu.memory_space<vmem>>, vector<1x8x32xbf16>
    %45 = vector.shape_cast %44 : vector<1x8x32xbf16> to vector<8x32xbf16>
    %46 = vector.shape_cast %43 : vector<8x32xbf16> to vector<1x8x32xbf16>
    tpu.vector_store %arg10[%c0_25, %c0_26, %c0_27], %46 {strides = array<i32>} : memref<1x8x32xbf16, #tpu.memory_space<vmem>>, vector<1x8x32xbf16>,
    return
  }
  func.func @transform_0(%arg0: i32, %arg1: i32) -> (i32, i32, i32) {
    %c0_i32 = arith.constant 0 : i32
    %c0_i32_0 = arith.constant 0 : i32
    return %arg0, %arg1, %c0_i32 : i32, i32, i32
  }
  func.func @transform_1(%arg0: i32, %arg1: i32) -> (i32, i32) {
    %c0_i32 = arith.constant 0 : i32
    %c0_i32_0 = arith.constant 0 : i32
    %c0_i32_1 = arith.constant 0 : i32
    return %c0_i32, %c0_i32_0 : i32, i32
  }
  func.func @transform_2(%arg0: i32, %arg1: i32) -> (i32, i32) {
    %c0_i32 = arith.constant 0 : i32
    %c0_i32_0 = arith.constant 0 : i32
    %c0_i32_1 = arith.constant 0 : i32
    return %c0_i32, %c0_i32_0 : i32, i32
  }
  func.func @transform_3(%arg0: i32, %arg1: i32) -> (i32, i32) {
    %c0_i32 = arith.constant 0 : i32
    %c0_i32_0 = arith.constant 0 : i32
    %c0_i32_1 = arith.constant 0 : i32
    return %c0_i32, %c0_i32_0 : i32, i32
  }
  func.func @transform_4(%arg0: i32, %arg1: i32) -> (i32, i32) {
    %c0_i32 = arith.constant 0 : i32
    %c0_i32_0 = arith.constant 0 : i32
    %c0_i32_1 = arith.constant 0 : i32
    return %c0_i32, %c0_i32_0 : i32, i32
  }
  func.func @transform_5(%arg0: i32, %arg1: i32) -> (i32, i32) {
    %c0_i32 = arith.constant 0 : i32
    %c0_i32_0 = arith.constant 0 : i32
    %c0_i32_1 = arith.constant 0 : i32
    return %c0_i32, %c0_i32_0 : i32, i32
  }
  func.func @transform_6(%arg0: i32, %arg1: i32) -> (i32, i32, i32) {
    %c0_i32 = arith.constant 0 : i32
    %c0_i32_0 = arith.constant 0 : i32
    return %arg0, %arg1, %c0_i32 : i32, i32, i32
  }
  func.func @transform_7(%arg0: i32, %arg1: i32) -> (i32, i32, i32) {
    %c0_i32 = arith.constant 0 : i32
    %c0_i32_0 = arith.constant 0 : i32
    return %arg0, %arg1, %c0_i32 : i32, i32, i32
  }
  func.func @transform_8(%arg0: i32, %arg1: i32) -> (i32, i32, i32) {
    %c0_i32 = arith.constant 0 : i32
    %c0_i32_0 = arith.constant 0 : i32
    return %arg0, %arg1, %c0_i32 : i32, i32, i32
  }
}

module attributes {stable_mosaic.version = 11 : i64} {
  func.func @qkv_kernel(%arg0: i32, %arg1: i32, %arg2: memref<1x8x32xf32, #tpu.memory_space<vmem>>, %arg3: memref<1x32xf32, #tpu.memory_space<vmem>>, %arg4: memref<1x32xf32, #tpu.memory_space<vmem>>, %arg5: memref<32x32xbf16, #tpu.memory_space<vmem>>, %arg6: memref<32x32xbf16, #tpu.memory_space<vmem>>, %arg7: memref<32x32xbf16, #tpu.memory_space<vmem>>, %arg8: memref<1x8x32xbf16, #tpu.memory_space<vmem>>, %arg9: memref<1x8x32xbf16, #tpu.memory_space<vmem>>, %arg10: memref<1x8x32xbf16, #tpu.memory_space<vmem>>) attributes {dimension_semantics = [#tpu.dimension_semantics<parallel>, #tpu.dimension_semantics<parallel>], iteration_bounds = array<i64: 2, 1>, scalar_prefetch = 0 : i64, scratch_operands = 0 : i64, tpu.core_type = #tpu.core_type<tc>, window_params = [{transform_indices = @transform_0, window_bounds = array<i64: 1, 8, 32>}, {pipeline_mode = #tpu.pipeline_mode<synchronous>, transform_indices = @transform_1, window_bounds = array<i64: 1, 32>}, {pipeline_mode = #tpu.pipeline_mode<synchronous>, transform_indices = @transform_2, window_bounds = array<i64: 1, 32>}, {pipeline_mode = #tpu.pipeline_mode<synchronous>, transform_indices = @transform_3, window_bounds = array<i64: 32, 32>}, {pipeline_mode = #tpu.pipeline_mode<synchronous>, transform_indices = @transform_4, window_bounds = array<i64: 32, 32>}, {pipeline_mode = #tpu.pipeline_mode<synchronous>, transform_indices = @transform_5, window_bounds = array<i64: 32, 32>}, {transform_indices = @transform_6, window_bounds = array<i64: 1, 8, 32>}, {transform_indices = @transform_7, window_bounds = array<i64: 1, 8, 32>}, {transform_indices = @transform_8, window_bounds = array<i64: 1, 8, 32>}]} {
    %c0 = arith.constant 0 : index
    %c0_0 = arith.constant 0 : index
    %c0_1 = arith.constant 0 : index
    %0 = vector.load %arg2[%c0, %c0_0, %c0_1] : memref<1x8x32xf32, #tpu.memory_space<vmem>>, vector<1x8x32xf32>
    %1 = vector.shape_cast %0 : vector<1x8x32xf32> to vector<8x32xf32>
    %cst = arith.constant dense<0.000000e+00> : vector<8xf32>
    %2 = vector.multi_reduction <add>, %1, %cst [1] : vector<8x32xf32> to vector<8xf32>
    %3 = vector.shape_cast %2 : vector<8xf32> to vector<8x1xf32>
    %cst_2 = arith.constant 3.200000e+01 : f32
    %4 = vector.broadcast %cst_2 : f32 to vector<8x1xf32>
    %5 = arith.divf %3, %4 : vector<8x1xf32>
    %6 = vector.broadcast %5 : vector<8x1xf32> to vector<8x32xf32>
    %7 = arith.subf %1, %6 : vector<8x32xf32>
    %8 = arith.mulf %7, %7 : vector<8x32xf32>
    %cst_3 = arith.constant dense<0.000000e+00> : vector<8xf32>
    %9 = vector.multi_reduction <add>, %8, %cst_3 [1] : vector<8x32xf32> to vector<8xf32>
    %10 = vector.shape_cast %9 : vector<8xf32> to vector<8x1xf32>
    %cst_4 = arith.constant 3.200000e+01 : f32
    %11 = vector.broadcast %cst_4 : f32 to vector<8x1xf32>
    %12 = arith.divf %10, %11 : vector<8x1xf32>
    %cst_5 = arith.constant 9.99999974E-6 : f32
    %13 = vector.broadcast %cst_5 : f32 to vector<8x1xf32>
    %14 = arith.addf %12, %13 : vector<8x1xf32>
    %15 = math.rsqrt %14 : vector<8x1xf32>
    %16 = vector.broadcast %15 : vector<8x1xf32> to vector<8x32xf32>
    %17 = arith.mulf %7, %16 : vector<8x32xf32>
    %c0_6 = arith.constant 0 : index
    %c0_7 = arith.constant 0 : index
    %18 = vector.load %arg3[%c0_6, %c0_7] : memref<1x32xf32, #tpu.memory_space<vmem>>, vector<1x32xf32>
    %19 = vector.shape_cast %18 : vector<1x32xf32> to vector<32xf32>
    %20 = vector.shape_cast %19 : vector<32xf32> to vector<1x32xf32>
    %21 = vector.broadcast %20 : vector<1x32xf32> to vector<8x32xf32>
    %22 = arith.mulf %17, %21 : vector<8x32xf32>
    %c0_8 = arith.constant 0 : index
    %c0_9 = arith.constant 0 : index
    %23 = vector.load %arg4[%c0_8, %c0_9] : memref<1x32xf32, #tpu.memory_space<vmem>>, vector<1x32xf32>
    %24 = vector.shape_cast %23 : vector<1x32xf32> to vector<32xf32>
    %25 = vector.shape_cast %24 : vector<32xf32> to vector<1x32xf32>
    %26 = vector.broadcast %25 : vector<1x32xf32> to vector<8x32xf32>
    %27 = arith.addf %22, %26 : vector<8x32xf32>
    %28 = arith.truncf %27 : vector<8x32xf32> to vector<8x32xbf16>
    %c0_10 = arith.constant 0 : index
    %c0_11 = arith.constant 0 : index
    %29 = vector.load %arg5[%c0_10, %c0_11] : memref<32x32xbf16, #tpu.memory_space<vmem>>, vector<32x32xbf16>
    %cst_12 = arith.constant dense<0.000000e+00> : vector<8x32xf32>
    %30 = tpu.matmul %28, %29, %cst_12 {dimension_numbers = #tpu.dot_dimension_numbers<[1], [0], [0], [1], [0, 0, 1, 1], [], []>} : vector<8x32xbf16>, vector<32x32xbf16>, vector<8x32xf32> -> vector<8x32xf32>
    %31 = arith.truncf %30 : vector<8x32xf32> to vector<8x32xbf16>
    %c0_13 = arith.constant 0 : index
    %c0_14 = arith.constant 0 : index
    %c0_15 = arith.constant 0 : index
    %32 = vector.load %arg8[%c0_13, %c0_14, %c0_15] : memref<1x8x32xbf16, #tpu.memory_space<vmem>>, vector<1x8x32xbf16>
    %33 = vector.shape_cast %32 : vector<1x8x32xbf16> to vector<8x32xbf16>
    %34 = vector.shape_cast %31 : vector<8x32xbf16> to vector<1x8x32xbf16>
    tpu.vector_store %arg8[%c0_13, %c0_14, %c0_15], %34 {strides = array<i32>} : memref<1x8x32xbf16, #tpu.memory_space<vmem>>, vector<1x8x32xbf16>,
    %c0_16 = arith.constant 0 : index
    %c0_17 = arith.constant 0 : index
    %35 = vector.load %arg6[%c0_16, %c0_17] : memref<32x32xbf16, #tpu.memory_space<vmem>>, vector<32x32xbf16>
    %cst_18 = arith.constant dense<0.000000e+00> : vector<8x32xf32>
    %36 = tpu.matmul %28, %35, %cst_18 {dimension_numbers = #tpu.dot_dimension_numbers<[1], [0], [0], [1], [0, 0, 1, 1], [], []>} : vector<8x32xbf16>, vector<32x32xbf16>, vector<8x32xf32> -> vector<8x32xf32>
    %37 = arith.truncf %36 : vector<8x32xf32> to vector<8x32xbf16>
    %c0_19 = arith.constant 0 : index
    %c0_20 = arith.constant 0 : index
    %c0_21 = arith.constant 0 : index
    %38 = vector.load %arg9[%c0_19, %c0_20, %c0_21] : memref<1x8x32xbf16, #tpu.memory_space<vmem>>, vector<1x8x32xbf16>
    %39 = vector.shape_cast %38 : vector<1x8x32xbf16> to vector<8x32xbf16>
    %40 = vector.shape_cast %37 : vector<8x32xbf16> to vector<1x8x32xbf16>
    tpu.vector_store %arg9[%c0_19, %c0_20, %c0_21], %40 {strides = array<i32>} : memref<1x8x32xbf16, #tpu.memory_space<vmem>>, vector<1x8x32xbf16>,
    %c0_22 = arith.constant 0 : index
    %c0_23 = arith.constant 0 : index
    %41 = vector.load %arg7[%c0_22, %c0_23] : memref<32x32xbf16, #tpu.memory_space<vmem>>, vector<32x32xbf16>
    %cst_24 = arith.constant dense<0.000000e+00> : vector<8x32xf32>
    %42 = tpu.matmul %28, %41, %cst_24 {dimension_numbers = #tpu.dot_dimension_numbers<[1], [0], [0], [1], [0, 0, 1, 1], [], []>} : vector<8x32xbf16>, vector<32x32xbf16>, vector<8x32xf32> -> vector<8x32xf32>
    %43 = arith.truncf %42 : vector<8x32xf32> to vector<8x32xbf16>
    %c0_25 = arith.constant 0 : index
    %c0_26 = arith.constant 0 : index
    %c0_27 = arith.constant 0 : index
    %44 = vector.load %arg10[%c0_25, %c0_26, %c0_27] : memref<1x8x32xbf16, #tpu.memory_space<vmem>>, vector<1x8x32xbf16>
    %45 = vector.shape_cast %44 : vector<1x8x32xbf16> to vector<8x32xbf16>
    %46 = vector.shape_cast %43 : vector<8x32xbf16> to vector<1x8x32xbf16>
    tpu.vector_store %arg10[%c0_25, %c0_26, %c0_27], %46 {strides = array<i32>} : memref<1x8x32xbf16, #tpu.memory_space<vmem>>, vector<1x8x32xbf16>,
    return
  }
  func.func @transform_0(%arg0: i32, %arg1: i32) -> (i32, i32, i32) {
    %c0_i32 = arith.constant 0 : i32
    %c0_i32_0 = arith.constant 0 : i32
    return %arg0, %arg1, %c0_i32 : i32, i32, i32
  }
  func.func @transform_1(%arg0: i32, %arg1: i32) -> (i32, i32) {
    %c0_i32 = arith.constant 0 : i32
    %c0_i32_0 = arith.constant 0 : i32
    %c0_i32_1 = arith.constant 0 : i32
    return %c0_i32, %c0_i32_0 : i32, i32
  }
  func.func @transform_2(%arg0: i32, %arg1: i32) -> (i32, i32) {
    %c0_i32 = arith.constant 0 : i32
    %c0_i32_0 = arith.constant 0 : i32
    %c0_i32_1 = arith.constant 0 : i32
    return %c0_i32, %c0_i32_0 : i32, i32
  }
  func.func @transform_3(%arg0: i32, %arg1: i32) -> (i32, i32) {
    %c0_i32 = arith.constant 0 : i32
    %c0_i32_0 = arith.constant 0 : i32
    %c0_i32_1 = arith.constant 0 : i32
    return %c0_i32, %c0_i32_0 : i32, i32
  }
  func.func @transform_4(%arg0: i32, %arg1: i32) -> (i32, i32) {
    %c0_i32 = arith.constant 0 : i32
    %c0_i32_0 = arith.constant 0 : i32
    %c0_i32_1 = arith.constant 0 : i32
    return %c0_i32, %c0_i32_0 : i32, i32
  }
  func.func @transform_5(%arg0: i32, %arg1: i32) -> (i32, i32) {
    %c0_i32 = arith.constant 0 : i32
    %c0_i32_0 = arith.constant 0 : i32
    %c0_i32_1 = arith.constant 0 : i32
    return %c0_i32, %c0_i32_0 : i32, i32
  }
  func.func @transform_6(%arg0: i32, %arg1: i32) -> (i32, i32, i32) {
    %c0_i32 = arith.constant 0 : i32
    %c0_i32_0 = arith.constant 0 : i32
    return %arg0, %arg1, %c0_i32 : i32, i32, i32
  }
  func.func @transform_7(%arg0: i32, %arg1: i32) -> (i32, i32, i32) {
    %c0_i32 = arith.constant 0 : i32
    %c0_i32_0 = arith.constant 0 : i32
    return %arg0, %arg1, %c0_i32 : i32, i32, i32
  }
  func.func @transform_8(%arg0: i32, %arg1: i32) -> (i32, i32, i32) {
    %c0_i32 = arith.constant 0 : i32
    %c0_i32_0 = arith.constant 0 : i32
    return %arg0, %arg1, %c0_i32 : i32, i32, i32
  }
}

</mosaic_0001>

<bundles_post_ra>
// kernel: tpu_custom_call.1
= control target key start
LH: loop header
LB: loop body
LE: loop exit
PB: predicated region body
PF: predicated region fallthrough
CT: control target
= control target key end

     0   :  { %s1622_s0 = inlined_call_operand.hbm [shape: f32[2,8,32], index: 0, kind: input, shape index: {}]   ;;  %s1623_s1 = inlined_call_operand.vmem [shape: f32[1,32], index: 1, kind: input, shape index: {}]   ;;  %s1624_s2 = inlined_call_operand.vmem [shape: f32[1,32], index: 2, kind: input, shape index: {}]   ;;  %s1625_s3 = inlined_call_operand.hbm [shape: bf16[32,32], index: 3, kind: input, shape index: {}]   ;;  %s1626_s4 = inlined_call_operand.hbm [shape: bf16[32,32], index: 4, kind: input, shape index: {}]   ;;  %s1627_s5 = inlined_call_operand.vmem [shape: bf16[32,32], index: 5, kind: input, shape index: {}]   ;;  %s1628_s6 = inlined_call_operand.hbm [shape: bf16[2,8,32], index: 6, kind: output, shape index: {0}]   ;;  %s1629_s7 = inlined_call_operand.hbm [shape: bf16[2,8,32], index: 7, kind: output, shape index: {1}]   ;;  %s1630_s8 = inlined_call_operand.hbm [shape: bf16[2,8,32], index: 8, kind: output, shape index: {2}]  }
   0x1   :  { %1637 = sst [smem:[#allocation18_spill]] %s1622_s0 }
   0x2   :  { %14 = vsyncpa [#allocation3], 0 }
   0x3   :  { %16 = vsyncpa [#allocation3 + $0x1], 0 }
   0x4   :  { %17 = vsyncpa [#allocation6], 0 }
   0x5   :  { %18 = vsyncpa [#allocation4], 0 }
   0x6   :  { %20 = vsyncpa [#allocation4 + $0x1], 0 }
   0x7   :  { %21 = vsyncpa [#allocation10], 0 }
   0x8   :  { %23 = vsyncpa [#allocation10 + $0x1], 0  ;;  %s1277_s27 = smov 0   ;;  %s1279_s28 = smov 0  }
   0x9   :  { %s1281_s29 = smov 0   ;;  %s1283_s30 = smov 0  }
   0xa   :  { %s1285_s9 = smov 0   ;;  %s1287_s10 = smov 0  }
   0xb LB: > { %1638 = sst [smem:[#allocation16_spill]] %s1200_s27  ;;  %s1308_s11 = sadd.s32 4294967295, %s1220_s10   ;;  %s1220_s10 = sphi %s1287_s10, %s29_s10   ;;  %s1216_s9 = sphi %s1285_s9, %s1661_s9   ;;  %s1212_s30 = sphi %s1283_s30, %s1660_s30   ;;  %s1208_s29 = sphi %s1281_s29, %s1659_s29   ;;  %s1204_s28 = sphi %s1279_s28, %s1658_s28   ;;  %s1200_s27 = sphi %s1277_s27, %s1657_s27  }
   0xc   : > { %s1632_s12 = sadd.s32 4294967294, %s1220_s10   ;;  %p63_p0 = scmp.ne.s32.totalorder %s1204_s28, %s1200_s27 }
   0xd   : > { %p1631_p1 = scmp.eq.s32.totalorder %s1308_s11, 0  ;;  %p200_p3 = scmp.eq.s32.totalorder %s1632_s12, 1 }
   0xe   : > { %p818_p5 = scmp.ge.s32.totalorder %s1220_s10, 1  ;;  %p263_p7 = scmp.lt.s32.totalorder %s1220_s10, 3 }
   0xf   : > { %p1319_p4 = por %p1631_p1, %p63_p0  ;;  %p1324_p6 = por %p200_p3, %p63_p0 }
  0x10   : > { %p1329_p8 = pnand %p818_p5, %p263_p7  ;;  %s1222_s16 = smov [#allocation5]  }
  0x11   : > { %s1639_s13 = scalar_select %p1319_p4, 1, 0 }
  0x12   : > { %s1640_s14 = scalar_select %p1324_p6, 1, 0 }
  0x13   : > { %s281_s17 = sshll.u32 %s1222_s16, 4  ;;  %p899_p9 = pneg %p1329_p8  ;;  %s1333_s17 = int_to_ptr.vmem [resolvable:$true] %s281_s17 }
  0x14   : > { %1641 = sst [smem:[#allocation17_spill]] %s1640_s14  ;;  %s1223_s19 = smov [#allocation7]  }
  0x15   : > { %p1340_p11 = pnand %p899_p9, %p1631_p1  ;;  %s294_s20 = sshll.u32 %s1223_s19, 4  ;;  %s1344_s20 = int_to_ptr.vmem [resolvable:$true] %s294_s20 }
  0x16   : > { %s988_s23 = scalar_lea.hbm %s1625_s3, 256 }
  0x17   : > { %p989_p12 = scmp.ne.s32.totalorder %s1625_s3, %s988_s23  ;;  %p990_p13 = pneg %p1340_p11 }
  0x18   : > { %p995_p5 = scmp.lt.u32.totalorder %s988_s23, %s1625_s3 }
  0x19   : > { %p991_p0 = pnand %p990_p13, %p989_p12 }
  0x1b   : > { %p992_p3 = pneg %p991_p0 }
  0x1d   : > { %p997_p7 = pnand %p995_p5, %p992_p3 }
  0x1f   : > { %1000 = shalt.err (!%p997_p7)
}
  0x20   : > { %s1001_s19 = scalar_lea.vmem %s1333_s17, 256  ;;  %p1009_p2 = scmp.lt.s32.totalorder %s1333_s17, %s1333_s17 }
  0x21   : > { %p1002_p9 = scmp.ne.s32.totalorder %s1333_s17, %s1001_s19  ;;  %p1010_p12 = scmp.lt.s32.totalorder %s1001_s19, %s1001_s19 }
  0x23   : > { %p1004_p10 = pnand %p1002_p9, %p990_p13  ;;  %p1011_p0 = por %p1010_p12, %p1009_p2 }
  0x25   : > { %p1005_p1 = pneg %p1004_p10 }
  0x27   : > { %p1012_p6 = pnand %p1011_p0, %p1005_p1 }
  0x29   : > { %1015 = shalt.err (!%p1012_p6)
}
  0x2a   : > { %s1224_s21 = smov 64   ;;  %s1225_s22 = smov 4  }
  0x2b   : > { %902 = dma.hbm_to_vmem [thread:$0]  (!%p1340_p11), %s1625_s3, 256, %s1333_s17, [#allocation6], %s1224_s21, %s1224_s21, %s1225_s22  }
  0x2c   : > { %s1016_s16 = scalar_lea.hbm %s1626_s4, 256 }
  0x2d   : > { %p1017_p2 = scmp.ne.s32.totalorder %s1626_s4, %s1016_s16  ;;  %p1023_p10 = scmp.lt.u32.totalorder %s1016_s16, %s1626_s4 }
  0x2f   : > { %p1019_p1 = pnand %p1017_p2, %p990_p13 }
  0x31   : > { %p1020_p6 = pneg %p1019_p1 }
  0x33   : > { %p1025_p3 = pnand %p1023_p10, %p1020_p6 }
  0x35   : > { %1028 = shalt.err (!%p1025_p3)
}
  0x36   : > { %s1029_s17 = scalar_lea.vmem %s1344_s20, 256  ;;  %p1037_p12 = scmp.lt.s32.totalorder %s1344_s20, %s1344_s20 }
  0x37   : > { %p1030_p5 = scmp.ne.s32.totalorder %s1344_s20, %s1029_s17  ;;  %p1038_p0 = scmp.lt.s32.totalorder %s1029_s17, %s1029_s17 }
  0x39   : > { %p1032_p7 = pnand %p1030_p5, %p990_p13  ;;  %p1039_p2 = por %p1038_p0, %p1037_p12 }
  0x3b   : > { %p1033_p9 = pneg %p1032_p7 }
  0x3d   : > { %p1040_p1 = pnand %p1039_p2, %p1033_p9 }
  0x3f   : > { %1043 = shalt.err (!%p1040_p1)
}
  0x40   : > { %905 = dma.hbm_to_vmem [thread:$0]  (!%p1340_p11), %s1626_s4, 256, %s1344_s20, [#allocation6], %s1224_s21, %s1224_s21, %s1225_s22  }
  0x41   : > { %s41_s14 = sadd.s32 1, %s1216_s9  ;;  %s50_s23 = sadd.s32 1, %s1208_s29 }
  0x42   : > { %p43_p13 = scmp.ge.s32.totalorder %s41_s14, 2  ;;  %p57_p6 = scmp.ne.s32.totalorder %s1208_s29, %s1204_s28 }
  0x43   : > { %p58_p10 = scmp.eq.s32.totalorder %s1220_s10, 0  ;;  %p922_p3 = scmp.lt.s32.totalorder %s1220_s10, 2 }
  0x44   : > { %s1663_s14 = smov (%p43_p13, %s41_s14), 0  ;;  %p1644_p7 = scmp.eq.s32.totalorder %s1308_s11, 1 }
  0x45   : > { %p59_p5 = por %p58_p10, %p57_p6  ;;  %s45_s24 = ssub.s32 %s1216_s9, %s1663_s14 }
  0x46   : > { %p1408_p9 = por %p1644_p7, %p57_p6  ;;  %s311_s25 = sand.u32 1, %s1208_s29  }
  0x47   : > { %p48_p12 = scmp.eq.s32.totalorder %s45_s24, 0  ;;  %s822_s20 = sshll.u32 %s311_s25, 3 }
  0x48   : > { %s1645_s18 = scalar_select %p1408_p9, 1, 0 }
  0x49   : > { %s823_s21 = sshll.u32 %s1216_s9, 7  ;;  %s1646_s0 = sld [smem:[#allocation18_spill]] }
  0x4a   : > { %s1417_s22 = scalar_select %p48_p12, %s1208_s29, %s50_s23  }
  0x4b   : > { %s315_s17 = scalar_lea.vmem [#allocation2], %s822_s20  ;;  %p1426_p11 = pnand %p922_p3, %p59_p5 }
  0x4c   : > { %s323_s27 = sshll.u32 %s315_s17, 4  ;;  %s312_s23 = scalar_lea.sflag [#allocation3], %s311_s25  ;;  %s1430_s27 = int_to_ptr.vmem [resolvable:$true] %s323_s27 }
  0x4d   : > { %p1046_p2 = pneg %p1426_p11 }
  0x4f   : > { %s1422_s19 = scalar_lea.hbm %s1646_s0, %s823_s21  ;;  %s1049_s26 = scalar_lea.hbm %s1646_s0, 256 }
  0x50   : > { %s1044_s24 = scalar_lea.hbm %s1422_s19, 128  ;;  %p1050_p6 = scmp.lt.u32.totalorder %s1422_s19, %s1646_s0 }
  0x51   : > { %p1045_p0 = scmp.ne.s32.totalorder %s1422_s19, %s1044_s24  ;;  %p1051_p10 = scmp.lt.u32.totalorder %s1049_s26, %s1044_s24 }
  0x52   : > { %p1053_p5 = scmp.lt.u32.totalorder %s1044_s24, %s1422_s19 }
  0x53   : > { %p1047_p1 = pnand %p1046_p2, %p1045_p0  ;;  %p1052_p3 = por %p1051_p10, %p1050_p6 }
  0x55   : > { %p1048_p13 = pneg %p1047_p1  ;;  %p1054_p7 = por %p1053_p5, %p1052_p3 }
  0x57   : > { %p1055_p12 = pnand %p1054_p7, %p1048_p13 }
  0x59   : > { %1058 = shalt.err (!%p1055_p12)
}
  0x5a   : > { %s1059_s25 = scalar_lea.vmem %s1430_s27, 128  ;;  %s1226_s20 = smov [#allocation2]  }
  0x5b   : > { %p1060_p0 = scmp.ne.s32.totalorder %s1430_s27, %s1059_s25  ;;  %s1064_s21 = sshll.u32 %s1226_s20, 4  ;;  %s1065_s21 = int_to_ptr.vmem [resolvable:$false] %s1064_s21 }
  0x5c   : > { %s1066_s16 = scalar_lea.vmem %s1065_s21, 256  ;;  %p1067_p4 = scmp.lt.s32.totalorder %s1430_s27, %s1065_s21 }
  0x5d   : > { %p1062_p1 = pnand %p1060_p0, %p1046_p2  ;;  %p1068_p6 = scmp.lt.s32.totalorder %s1066_s16, %s1059_s25 }
  0x5f   : > { %p1063_p9 = pneg %p1062_p1  ;;  %p1069_p10 = por %p1068_p6, %p1067_p4 }
  0x61   : > { %p1070_p3 = pnand %p1069_p10, %p1063_p9 }
  0x63   : > { %1073 = shalt.err (!%p1070_p3)
}
  0x64   : > { %909 = dma.hbm_to_vmem [thread:$0]  (!%p1426_p11), %s1422_s19, 128, %s1430_s27, %s312_s23  }
  0x65   : > { %332 = sbr.rel (%p1329_p8) target bundleno = 703 (0x2bf), region = 44  ;;  %s1460_s24 = sand.u32 (!%p1329_p8), 1, %s1204_s28  }
  0x66   : > { %s825_s26 = sshll.u32 (!%p1329_p8), %s1460_s24, 3  ;;  %s335_s17 = scalar_lea.sflag (!%p1329_p8), [#allocation3], %s1460_s24 }
  0x67   : > { %s338_s25 = scalar_lea.vmem (!%p1329_p8), [#allocation2], %s825_s26  ;;  %p1648_p4 = scmp.ne.s32.totalorder (!%p1329_p8), %s1639_s13, 0 }
  0x6c   : > { %1183 = dma.done.wait (%p1648_p4), %s335_s17, 128  }
  0x6d   : > { %1185 = vsyncadd (%p1648_p4), %s335_s17, 4294967168  ;;  %p1649_p9 = scmp.eq.s32.totalorder %s1308_s11, 0 }
  0x6f   : > { %1187 = dma.done.wait (%p1649_p9), [#allocation6], 512   ;;  %p1650_p11 = pmov %p1649_p9 }
  0x70   : > { %vm391_vm0 = vcmask 261120   ;;  %v390_v0 = vld [vmem:[%s338_s25] sm:$0xff]  ;;  %v980_v7 = vld [vmem:[#allocation5] sm:$0xff]   ;;  %v1227_v9 = vmov 0.0   ;;  %v982_v10 = vld [vmem:[#allocation5 + $0x8] sm:$0xff]   ;;  %vm1228_vm1 = vmmov 0  }
  0x71   : > { %1189 = vsyncadd (%p1650_p11), [#allocation6], 4294966784  ;;  %v392_v1 = vsel %vm391_vm0, %v390_v0, 0.0  ;;  %v981_v8 = vld [vmem:[#allocation7] sm:$0xff]   ;;  %859 = vmatprep.subr.bf16.mxu0 %v1227_v9  ;;  %867 = vmatprep.subr.bf16.mxu1 %v1227_v9  ;;  %v983_v11 = vld [vmem:[#allocation7 + $0x8] sm:$0xff]   ;;  %s1493_s16 = sshll.u32 %s1460_s24, 2 }
  0x72   : > { %393 = vadd.xlane.f32.xlu0 %v392_v1  ;;  %860 = vmatpush3.bf16.msra.mxu0 %v980_v7  ;;  %v831_v16 = vld [vmem:[%s1623_s1] ss:$0 sm:$0xff]  ;;  %v985_v23 = vld [vmem:[%s1627_s5 + $0x8] sm:$0xff]   ;;  %s606_s26 = sand.u32 1, %s1308_s11   ;;  %s1497_s17 = sshll.u32 %s1212_s30, 6  ;;  %vm483_vm2 = vcmask 257024  }
  0x73   : > { %868 = vmatpush3.bf16.msra.mxu1 %v981_v8  ;;  %861 = vmatprep.subr.bf16.mxu0 %v1227_v9  ;;  %v832_v18 = vld [vmem:[%s1624_s2] ss:$0 sm:$0xff]  ;;  %s381_s25 = scalar_lea.vmem [#allocation9], %s1493_s16  ;;  %s374_s15 = scalar_lea.vmem [#allocation8], %s1493_s16 }
  0x74   : > { %869 = vmatprep.subr.bf16.mxu1 %v1227_v9  ;;  %863 = vmatprep.mubr.msk.bf16.mxu0 %vm1228_vm1, %v1227_v9  ;;  %v984_v21 = vld [vmem:[%s1627_s5] sm:$0xff]   ;;  %s640_s13 = sshll.u32 %s381_s25, 4  ;;  %s626_s19 = sshll.u32 %s374_s15, 4  ;;  %s1507_s13 = int_to_ptr.vmem [resolvable:$true] %s640_s13  ;;  %s1515_s19 = int_to_ptr.vmem [resolvable:$true] %s626_s19 }
  0x75   : > { %871 = vmatprep.mubr.msk.bf16.mxu1 %vm1228_vm1, %v1227_v9  ;;  %s1505_s23 = scalar_lea.hbm %s1629_s7, %s1497_s17  ;;  %s1513_s20 = scalar_lea.hbm %s1628_s6, %s1497_s17 }
  0x76   : > { %862 = vmatpush3.bf16.msra.mxu0 %v982_v10  ;;  %s1519_s21 = scalar_lea.sflag [#allocation10], %s606_s26  ;;  %s1074_s27 = scalar_lea.vmem %s1507_s13, 64 }
  0x77   : > { %870 = vmatpush3.bf16.msra.mxu1 %v983_v11  ;;  %875 = vmatprep.subr.bf16.mxu0 %v1227_v9  ;;  %p1075_p8 = scmp.ne.s32.totalorder %s1507_s13, %s1074_s27  ;;  %p1651_p2 = scmp.ne.s32.totalorder %s1645_s18, 0 }
  0x78   : > { %s1229_s12 = smov [#allocation9]  }
  0x79   : > { %p1076_p13 = pnand %p1075_p8, %p1651_p2  ;;  %s1078_s30 = sshll.u32 %s1229_s12, 4  ;;  %s1079_s30 = int_to_ptr.vmem [resolvable:$false] %s1078_s30 }
  0x7a   : > { %s1080_s11 = scalar_lea.vmem %s1079_s30, 128  ;;  %p1081_p7 = scmp.lt.s32.totalorder %s1507_s13, %s1079_s30 }
  0x7b   : > { %p1077_p5 = pneg %p1076_p13  ;;  %p1082_p12 = scmp.lt.s32.totalorder %s1080_s11, %s1074_s27 }
  0x7d   : > { %p1083_p0 = por %p1082_p12, %p1081_p7 }
  0x7f   : > { %p1084_p1 = pnand %p1083_p0, %p1077_p5 }
  0xff   : > { %v394_v2 = vpop.xlane.xlu0 %393 }
 0x100   : > { %v396_v3 = vmul.f32 0.03125, %v394_v2 }
 0x102   : > { %v397_v4 = vsub.f32 %v390_v0, %v396_v3 }
 0x104   : > { %v398_v5 = vmul.f32 %v397_v4, %v397_v4 }
 0x106   : > { %v399_v6 = vsel %vm391_vm0, %v398_v5, 0.0 }
 0x107   : > { %400 = vadd.xlane.f32.xlu0 %v399_v6 }
 0x194   : > { %v401_v12 = vpop.xlane.xlu0 %400 }
 0x195   : > { %v402_v13 = vmul.f32 0.03125, %v401_v12 }
 0x197   : > { %v403_v14 = vadd.f32 1e-05, %v402_v13 }
 0x199   : > { %986 = vrsqrt.f32 %v403_v14 }
 0x1a3   : > { %v987_v15 = vpop.eup %986 }
 0x1a4   : > { %v405_v17 = vmul.f32 %v987_v15, %v397_v4 }
 0x1a6   : > { %v413_v19 = vmul.f32 %v831_v16, %v405_v17 }
 0x1a8   : > { %v421_v20 = vadd.f32 %v832_v18, %v413_v19 }
 0x1aa   : > { %v422_v22 = vpack.c.bf16 %v421_v20, %v421_v20 }
 0x1ac   : > { %864 = vmatmul.mubr.msk.bf16.vlgmr.msra.gmra.mrb[0].mxu0 %vm391_vm0, %v422_v22  ;;  %872 = vmatmul.mubr.msk.bf16.vlgmr.msra.gmra.mrb[0].mxu1 %vm391_vm0, %v422_v22 }
 0x1ad   : > { %876 = vmatpush3.bf16.msra.mxu0 %v984_v21  ;;  %879 = vmatprep.mubr.msk.bf16.mxu0 %vm1228_vm1, %v1227_v9 }
 0x1ae   : > { %877 = vmatprep.subr.bf16.mxu0 %v1227_v9 }
 0x1b1   : > { %878 = vmatpush3.bf16.msra.mxu0 %v985_v23 }
 0x1b4   : > { %880 = vmatmul.mubr.msk.bf16.vlgmr.msra.gmra.mrb[4].mxu0 %vm391_vm0, %v422_v22 }
 0x27f   : > { %v476_v24 = vpop.f32.mrb[0].mxu0  ;;  %v535_v25 = vpop.f32.mrb[0].mxu1 }
 0x280   : > { %v482_v26 = vpack.c.bf16 %v476_v24, %v476_v24  ;;  %v541_v27 = vpack.c.bf16 %v535_v25, %v535_v25  ;;  %v865_v28 = vpop.f32.mrb[1].mxu0  ;;  %v873_v29 = vpop.f32.mrb[1].mxu1 }
 0x281   : > { %v479_v30 = vpop.f32.mrb[2].mxu0  ;;  %v538_v31 = vpop.f32.mrb[2].mxu1 }
 0x282   : > { %v866_v32 = vpop.f32.mrb[3].mxu0  ;;  %v874_v33 = vpop.f32.mrb[3].mxu1  ;;  %542 = vst.msk [vmem:[%s381_s25] sm:$0xf] %vm483_vm2, %v541_v27  ;;  %484 = vst.msk [vmem:[%s374_s15] sm:$0xf] %vm483_vm2, %v482_v26 }
 0x283   : > { %1087 = shalt.err (!%p1084_p1)
}
 0x284   : > { %s1088_s26 = scalar_lea.hbm %s1505_s23, 64  ;;  %s1092_s12 = scalar_lea.hbm %s1629_s7, 128 }
 0x285   : > { %p1089_p6 = scmp.ne.s32.totalorder %s1505_s23, %s1088_s26  ;;  %p1093_p4 = scmp.lt.u32.totalorder %s1505_s23, %s1629_s7 }
 0x286   : > { %p1094_p9 = scmp.lt.u32.totalorder %s1092_s12, %s1088_s26  ;;  %p1096_p8 = scmp.lt.u32.totalorder %s1088_s26, %s1505_s23 }
 0x287   : > { %p1090_p10 = pnand %p1089_p6, %p1651_p2 }
 0x288   : > { %p1095_p11 = por %p1094_p9, %p1093_p4 }
 0x289   : > { %p1091_p3 = pneg %p1090_p10 }
 0x28a   : > { %p1097_p13 = por %p1096_p8, %p1095_p11 }
 0x28c   : > { %p1098_p5 = pnand %p1097_p13, %p1091_p3 }
 0x28e   : > { %1101 = shalt.err (!%p1098_p5)
}
 0x28f   : > { %894 = dma.vmem_to_hbm [thread:$0]  (%p1651_p2), %s1507_s13, 64, %s1505_s23, %s1519_s21  }
 0x290   : > { %s602_s27 = scalar_lea.sflag [#allocation4], %s1460_s24  ;;  %s1102_s0 = scalar_lea.vmem %s1515_s19, 64 }
 0x291   : > { %p1103_p7 = scmp.ne.s32.totalorder %s1515_s19, %s1102_s0  ;;  %s1230_s11 = smov [#allocation8]  }
 0x292   : > { %s1106_s26 = sshll.u32 %s1230_s11, 4  ;;  %s1107_s26 = int_to_ptr.vmem [resolvable:$false] %s1106_s26 }
 0x293   : > { %p1104_p12 = pnand %p1103_p7, %p1651_p2  ;;  %s1108_s25 = scalar_lea.vmem %s1107_s26, 128 }
 0x294   : > { %p1109_p1 = scmp.lt.s32.totalorder %s1515_s19, %s1107_s26  ;;  %p1110_p6 = scmp.lt.s32.totalorder %s1108_s25, %s1102_s0 }
 0x295   : > { %p1105_p0 = pneg %p1104_p12 }
 0x296   : > { %p1111_p10 = por %p1110_p6, %p1109_p1 }
 0x298   : > { %p1112_p3 = pnand %p1111_p10, %p1105_p0 }
 0x29a   : > { %1115 = shalt.err (!%p1112_p3)
}
 0x29b   : > { %s1116_s24 = scalar_lea.hbm %s1513_s20, 64  ;;  %s1120_s15 = scalar_lea.hbm %s1628_s6, 128 }
 0x29c   : > { %p1117_p4 = scmp.ne.s32.totalorder %s1513_s20, %s1116_s24  ;;  %p1121_p8 = scmp.lt.u32.totalorder %s1513_s20, %s1628_s6 }
 0x29d   : > { %p1122_p13 = scmp.lt.u32.totalorder %s1120_s15, %s1116_s24  ;;  %p1124_p7 = scmp.lt.u32.totalorder %s1116_s24, %s1513_s20 }
 0x29e   : > { %p1118_p9 = pnand %p1117_p4, %p1651_p2 }
 0x29f   : > { %p1123_p5 = por %p1122_p13, %p1121_p8 }
 0x2a0   : > { %p1119_p11 = pneg %p1118_p9 }
 0x2a1   : > { %p1125_p12 = por %p1124_p7, %p1123_p5 }
 0x2a3   : > { %p1126_p0 = pnand %p1125_p12, %p1119_p11 }
 0x2a5   : > { %1129 = shalt.err (!%p1126_p0)
}
 0x2a6   : > { %893 = dma.vmem_to_hbm [thread:$0]  (%p1651_p2), %s1515_s19, 64, %s1513_s20, %s602_s27   ;;  %v593_v34 = vpop.f32.mrb[4].mxu0 }
 0x2a7   : > { %s388_s0 = scalar_lea.vmem [#allocation11], %s1493_s16  ;;  %v599_v35 = vpack.c.bf16 %v593_v34, %v593_v34  ;;  %v881_v36 = vpop.f32.mrb[5].mxu0  ;;  %s1570_s24 = scalar_lea.hbm %s1630_s8, %s1497_s17 }
 0x2a8   : > { %s654_s11 = sshll.u32 %s388_s0, 4  ;;  %v596_v37 = vpop.f32.mrb[6].mxu0  ;;  %s1231_s16 = smov [#allocation11]   ;;  %s1572_s11 = int_to_ptr.vmem [resolvable:$true] %s654_s11 }
 0x2a9   : > { %v882_v38 = vpop.f32.mrb[7].mxu0  ;;  %600 = vst.msk [vmem:[%s388_s0] sm:$0xf] %vm483_vm2, %v599_v35  ;;  %s1130_s19 = scalar_lea.vmem %s1572_s11, 64  ;;  %s1134_s20 = sshll.u32 %s1231_s16, 4  ;;  %s1135_s20 = int_to_ptr.vmem [resolvable:$false] %s1134_s20 }
 0x2aa   : > { %p1131_p1 = scmp.ne.s32.totalorder %s1572_s11, %s1130_s19  ;;  %s1136_s27 = scalar_lea.vmem %s1135_s20, 128 }
 0x2ab   : > { %p1137_p3 = scmp.lt.s32.totalorder %s1572_s11, %s1135_s20  ;;  %p1138_p4 = scmp.lt.s32.totalorder %s1136_s27, %s1130_s19 }
 0x2ac   : > { %p1132_p6 = pnand %p1131_p1, %p1651_p2 }
 0x2ad   : > { %p1139_p9 = por %p1138_p4, %p1137_p3 }
 0x2ae   : > { %p1133_p10 = pneg %p1132_p6 }
 0x2b0   : > { %p1140_p11 = pnand %p1139_p9, %p1133_p10 }
 0x2b2   : > { %1143 = shalt.err (!%p1140_p11)
}
 0x2b3   : > { %s1144_s17 = scalar_lea.hbm %s1570_s24, 64  ;;  %s1148_s15 = scalar_lea.hbm %s1630_s8, 128 }
 0x2b4   : > { %p1145_p8 = scmp.ne.s32.totalorder %s1570_s24, %s1144_s17  ;;  %p1149_p7 = scmp.lt.u32.totalorder %s1570_s24, %s1630_s8 }
 0x2b5   : > { %p1150_p12 = scmp.lt.u32.totalorder %s1148_s15, %s1144_s17  ;;  %p1152_p1 = scmp.lt.u32.totalorder %s1144_s17, %s1570_s24 }
 0x2b6   : > { %p1146_p13 = pnand %p1145_p8, %p1651_p2 }
 0x2b7   : > { %p1151_p0 = por %p1150_p12, %p1149_p7 }
 0x2b8   : > { %p1147_p5 = pneg %p1146_p13 }
 0x2b9   : > { %p1153_p6 = por %p1152_p1, %p1151_p0 }
 0x2bb   : > { %p1154_p10 = pnand %p1153_p6, %p1147_p5 }
 0x2bd   : > { %1157 = shalt.err (!%p1154_p10)
}
 0x2be   : > { %895 = dma.vmem_to_hbm [thread:$0]  (%p1651_p2), %s1572_s11, 64, %s1570_s24, %s1519_s21  }
 0x2bf PF: > { %s1652_s0 = sld [smem:[#allocation16_spill]]  ;;  %s1653_s26 = sld [smem:[#allocation17_spill]] }
 0x2c0   : > { %p1655_p4 = scmp.ge.s32.totalorder %s1220_s10, 2 }
 0x2c5   : > { %s666_s25 = sand.u32 1, %s1652_s0   ;;  %p1654_p3 = scmp.ne.s32.totalorder %s1653_s26, 0 }
 0x2c6   : > { %s667_s19 = scalar_lea.sflag [#allocation4], %s666_s25 }
 0x2c7   : > { %p911_p9 = pnand %p1655_p4, %p1654_p3 }
 0x2c9   : > { %1191 = dma.done.wait (!%p911_p9), %s667_s19, 64  }
 0x2ca   : > { %1193 = vsyncadd (!%p911_p9), %s667_s19, 4294967232  ;;  %s1656_s16 = sadd.s32 4294967294, %s1220_s10  }
 0x2cb   : > { %s675_s20 = sand.u32 1, %s1656_s16  }
 0x2cc   : > { %s676_s27 = scalar_lea.sflag [#allocation10], %s675_s20 }
 0x2cd   : > { %1195 = dma.done.wait (!%p911_p9), %s676_s27, 128  }
 0x2ce   : > { %1197 = vsyncadd (!%p911_p9), %s676_s27, 4294967168  ;;  %s29_s10 = sadd.s32 1, %s1220_s10   ;;  %s1657_s27 = smov %s1204_s28 }
 0x2cf   : > { %p26_p2 = scmp.ge.s32.totalorder %s29_s10, 4   ;;  %s1658_s28 = smov %s1208_s29 }
 0x2d0   : > { %s1659_s29 = smov %s1417_s22  ;;  %s1660_s30 = smov %s1216_s9 }
 0x2d1   : > { %s1661_s9 = smov %s1663_s14  ;;  %28 = sbr.rel (!%p26_p2) target bundleno = 11 (0xb), region = 129 }
 0x2d8   :  { %690 = vsyncpa [#allocation3], 1 }
 0x2d9   :  { %692 = vsyncpa [#allocation3 + $0x1], 1 }
 0x2da   :  { %693 = vsyncpa [#allocation6], 1 }
 0x2db   :  { %694 = vsyncpa [#allocation4], 1 }
 0x2dc   :  { %696 = vsyncpa [#allocation4 + $0x1], 1 }
 0x2dd   :  { %697 = vsyncpa [#allocation10], 1 }
 0x2de   :  { %699 = vsyncpa [#allocation10 + $0x1], 1 }

// kernel: tpu_custom_call.1
= control target key start
LH: loop header
LB: loop body
LE: loop exit
PB: predicated region body
PF: predicated region fallthrough
CT: control target
= control target key end

     0   :  { %s1622_s0 = inlined_call_operand.hbm [shape: f32[2,8,32], index: 0, kind: input, shape index: {}]   ;;  %s1623_s1 = inlined_call_operand.vmem [shape: f32[1,32], index: 1, kind: input, shape index: {}]   ;;  %s1624_s2 = inlined_call_operand.vmem [shape: f32[1,32], index: 2, kind: input, shape index: {}]   ;;  %s1625_s3 = inlined_call_operand.hbm [shape: bf16[32,32], index: 3, kind: input, shape index: {}]   ;;  %s1626_s4 = inlined_call_operand.hbm [shape: bf16[32,32], index: 4, kind: input, shape index: {}]   ;;  %s1627_s5 = inlined_call_operand.vmem [shape: bf16[32,32], index: 5, kind: input, shape index: {}]   ;;  %s1628_s6 = inlined_call_operand.hbm [shape: bf16[2,8,32], index: 6, kind: output, shape index: {0}]   ;;  %s1629_s7 = inlined_call_operand.hbm [shape: bf16[2,8,32], index: 7, kind: output, shape index: {1}]   ;;  %s1630_s8 = inlined_call_operand.hbm [shape: bf16[2,8,32], index: 8, kind: output, shape index: {2}]  }
   0x1   :  { %1637 = sst [smem:[#allocation18_spill]] %s1622_s0 }
   0x2   :  { %14 = vsyncpa [#allocation3], 0 }
   0x3   :  { %16 = vsyncpa [#allocation3 + $0x1], 0 }
   0x4   :  { %17 = vsyncpa [#allocation6], 0 }
   0x5   :  { %18 = vsyncpa [#allocation4], 0 }
   0x6   :  { %20 = vsyncpa [#allocation4 + $0x1], 0 }
   0x7   :  { %21 = vsyncpa [#allocation10], 0 }
   0x8   :  { %23 = vsyncpa [#allocation10 + $0x1], 0  ;;  %s1277_s27 = smov 0   ;;  %s1279_s28 = smov 0  }
   0x9   :  { %s1281_s29 = smov 0   ;;  %s1283_s30 = smov 0  }
   0xa   :  { %s1285_s9 = smov 0   ;;  %s1287_s10 = smov 0  }
   0xb LB: > { %1638 = sst [smem:[#allocation16_spill]] %s1200_s27  ;;  %s1308_s11 = sadd.s32 4294967295, %s1220_s10   ;;  %s1220_s10 = sphi %s1287_s10, %s29_s10   ;;  %s1216_s9 = sphi %s1285_s9, %s1661_s9   ;;  %s1212_s30 = sphi %s1283_s30, %s1660_s30   ;;  %s1208_s29 = sphi %s1281_s29, %s1659_s29   ;;  %s1204_s28 = sphi %s1279_s28, %s1658_s28   ;;  %s1200_s27 = sphi %s1277_s27, %s1657_s27  }
   0xc   : > { %s1632_s12 = sadd.s32 4294967294, %s1220_s10   ;;  %p63_p0 = scmp.ne.s32.totalorder %s1204_s28, %s1200_s27 }
   0xd   : > { %p1631_p1 = scmp.eq.s32.totalorder %s1308_s11, 0  ;;  %p200_p3 = scmp.eq.s32.totalorder %s1632_s12, 1 }
   0xe   : > { %p818_p5 = scmp.ge.s32.totalorder %s1220_s10, 1  ;;  %p263_p7 = scmp.lt.s32.totalorder %s1220_s10, 3 }
   0xf   : > { %p1319_p4 = por %p1631_p1, %p63_p0  ;;  %p1324_p6 = por %p200_p3, %p63_p0 }
  0x10   : > { %p1329_p8 = pnand %p818_p5, %p263_p7  ;;  %s1222_s16 = smov [#allocation5]  }
  0x11   : > { %s1639_s13 = scalar_select %p1319_p4, 1, 0 }
  0x12   : > { %s1640_s14 = scalar_select %p1324_p6, 1, 0 }
  0x13   : > { %s281_s17 = sshll.u32 %s1222_s16, 4  ;;  %p899_p9 = pneg %p1329_p8  ;;  %s1333_s17 = int_to_ptr.vmem [resolvable:$true] %s281_s17 }
  0x14   : > { %1641 = sst [smem:[#allocation17_spill]] %s1640_s14  ;;  %s1223_s19 = smov [#allocation7]  }
  0x15   : > { %p1340_p11 = pnand %p899_p9, %p1631_p1  ;;  %s294_s20 = sshll.u32 %s1223_s19, 4  ;;  %s1344_s20 = int_to_ptr.vmem [resolvable:$true] %s294_s20 }
  0x16   : > { %s988_s23 = scalar_lea.hbm %s1625_s3, 256 }
  0x17   : > { %p989_p12 = scmp.ne.s32.totalorder %s1625_s3, %s988_s23  ;;  %p990_p13 = pneg %p1340_p11 }
  0x18   : > { %p995_p5 = scmp.lt.u32.totalorder %s988_s23, %s1625_s3 }
  0x19   : > { %p991_p0 = pnand %p990_p13, %p989_p12 }
  0x1b   : > { %p992_p3 = pneg %p991_p0 }
  0x1d   : > { %p997_p7 = pnand %p995_p5, %p992_p3 }
  0x1f   : > { %1000 = shalt.err (!%p997_p7)
}
  0x20   : > { %s1001_s19 = scalar_lea.vmem %s1333_s17, 256  ;;  %p1009_p2 = scmp.lt.s32.totalorder %s1333_s17, %s1333_s17 }
  0x21   : > { %p1002_p9 = scmp.ne.s32.totalorder %s1333_s17, %s1001_s19  ;;  %p1010_p12 = scmp.lt.s32.totalorder %s1001_s19, %s1001_s19 }
  0x23   : > { %p1004_p10 = pnand %p1002_p9, %p990_p13  ;;  %p1011_p0 = por %p1010_p12, %p1009_p2 }
  0x25   : > { %p1005_p1 = pneg %p1004_p10 }
  0x27   : > { %p1012_p6 = pnand %p1011_p0, %p1005_p1 }
  0x29   : > { %1015 = shalt.err (!%p1012_p6)
}
  0x2a   : > { %s1224_s21 = smov 64   ;;  %s1225_s22 = smov 4  }
  0x2b   : > { %902 = dma.hbm_to_vmem [thread:$0]  (!%p1340_p11), %s1625_s3, 256, %s1333_s17, [#allocation6], %s1224_s21, %s1224_s21, %s1225_s22  }
  0x2c   : > { %s1016_s16 = scalar_lea.hbm %s1626_s4, 256 }
  0x2d   : > { %p1017_p2 = scmp.ne.s32.totalorder %s1626_s4, %s1016_s16  ;;  %p1023_p10 = scmp.lt.u32.totalorder %s1016_s16, %s1626_s4 }
  0x2f   : > { %p1019_p1 = pnand %p1017_p2, %p990_p13 }
  0x31   : > { %p1020_p6 = pneg %p1019_p1 }
  0x33   : > { %p1025_p3 = pnand %p1023_p10, %p1020_p6 }
  0x35   : > { %1028 = shalt.err (!%p1025_p3)
}
  0x36   : > { %s1029_s17 = scalar_lea.vmem %s1344_s20, 256  ;;  %p1037_p12 = scmp.lt.s32.totalorder %s1344_s20, %s1344_s20 }
  0x37   : > { %p1030_p5 = scmp.ne.s32.totalorder %s1344_s20, %s1029_s17  ;;  %p1038_p0 = scmp.lt.s32.totalorder %s1029_s17, %s1029_s17 }
  0x39   : > { %p1032_p7 = pnand %p1030_p5, %p990_p13  ;;  %p1039_p2 = por %p1038_p0, %p1037_p12 }
  0x3b   : > { %p1033_p9 = pneg %p1032_p7 }
  0x3d   : > { %p1040_p1 = pnand %p1039_p2, %p1033_p9 }
  0x3f   : > { %1043 = shalt.err (!%p1040_p1)
}
  0x40   : > { %905 = dma.hbm_to_vmem [thread:$0]  (!%p1340_p11), %s1626_s4, 256, %s1344_s20, [#allocation6], %s1224_s21, %s1224_s21, %s1225_s22  }
  0x41   : > { %s41_s14 = sadd.s32 1, %s1216_s9  ;;  %s50_s23 = sadd.s32 1, %s1208_s29 }
  0x42   : > { %p43_p13 = scmp.ge.s32.totalorder %s41_s14, 2  ;;  %p57_p6 = scmp.ne.s32.totalorder %s1208_s29, %s1204_s28 }
  0x43   : > { %p58_p10 = scmp.eq.s32.totalorder %s1220_s10, 0  ;;  %p922_p3 = scmp.lt.s32.totalorder %s1220_s10, 2 }
  0x44   : > { %s1663_s14 = smov (%p43_p13, %s41_s14), 0  ;;  %p1644_p7 = scmp.eq.s32.totalorder %s1308_s11, 1 }
  0x45   : > { %p59_p5 = por %p58_p10, %p57_p6  ;;  %s45_s24 = ssub.s32 %s1216_s9, %s1663_s14 }
  0x46   : > { %p1408_p9 = por %p1644_p7, %p57_p6  ;;  %s311_s25 = sand.u32 1, %s1208_s29  }
  0x47   : > { %p48_p12 = scmp.eq.s32.totalorder %s45_s24, 0  ;;  %s822_s20 = sshll.u32 %s311_s25, 3 }
  0x48   : > { %s1645_s18 = scalar_select %p1408_p9, 1, 0 }
  0x49   : > { %s823_s21 = sshll.u32 %s1216_s9, 7  ;;  %s1646_s0 = sld [smem:[#allocation18_spill]] }
  0x4a   : > { %s1417_s22 = scalar_select %p48_p12, %s1208_s29, %s50_s23  }
  0x4b   : > { %s315_s17 = scalar_lea.vmem [#allocation2], %s822_s20  ;;  %p1426_p11 = pnand %p922_p3, %p59_p5 }
  0x4c   : > { %s323_s27 = sshll.u32 %s315_s17, 4  ;;  %s312_s23 = scalar_lea.sflag [#allocation3], %s311_s25  ;;  %s1430_s27 = int_to_ptr.vmem [resolvable:$true] %s323_s27 }
  0x4d   : > { %p1046_p2 = pneg %p1426_p11 }
  0x4f   : > { %s1422_s19 = scalar_lea.hbm %s1646_s0, %s823_s21  ;;  %s1049_s26 = scalar_lea.hbm %s1646_s0, 256 }
  0x50   : > { %s1044_s24 = scalar_lea.hbm %s1422_s19, 128  ;;  %p1050_p6 = scmp.lt.u32.totalorder %s1422_s19, %s1646_s0 }
  0x51   : > { %p1045_p0 = scmp.ne.s32.totalorder %s1422_s19, %s1044_s24  ;;  %p1051_p10 = scmp.lt.u32.totalorder %s1049_s26, %s1044_s24 }
  0x52   : > { %p1053_p5 = scmp.lt.u32.totalorder %s1044_s24, %s1422_s19 }
  0x53   : > { %p1047_p1 = pnand %p1046_p2, %p1045_p0  ;;  %p1052_p3 = por %p1051_p10, %p1050_p6 }
  0x55   : > { %p1048_p13 = pneg %p1047_p1  ;;  %p1054_p7 = por %p1053_p5, %p1052_p3 }
  0x57   : > { %p1055_p12 = pnand %p1054_p7, %p1048_p13 }
  0x59   : > { %1058 = shalt.err (!%p1055_p12)
}
  0x5a   : > { %s1059_s25 = scalar_lea.vmem %s1430_s27, 128  ;;  %s1226_s20 = smov [#allocation2]  }
  0x5b   : > { %p1060_p0 = scmp.ne.s32.totalorder %s1430_s27, %s1059_s25  ;;  %s1064_s21 = sshll.u32 %s1226_s20, 4  ;;  %s1065_s21 = int_to_ptr.vmem [resolvable:$false] %s1064_s21 }
  0x5c   : > { %s1066_s16 = scalar_lea.vmem %s1065_s21, 256  ;;  %p1067_p4 = scmp.lt.s32.totalorder %s1430_s27, %s1065_s21 }
  0x5d   : > { %p1062_p1 = pnand %p1060_p0, %p1046_p2  ;;  %p1068_p6 = scmp.lt.s32.totalorder %s1066_s16, %s1059_s25 }
  0x5f   : > { %p1063_p9 = pneg %p1062_p1  ;;  %p1069_p10 = por %p1068_p6, %p1067_p4 }
  0x61   : > { %p1070_p3 = pnand %p1069_p10, %p1063_p9 }
  0x63   : > { %1073 = shalt.err (!%p1070_p3)
}
  0x64   : > { %909 = dma.hbm_to_vmem [thread:$0]  (!%p1426_p11), %s1422_s19, 128, %s1430_s27, %s312_s23  }
  0x65   : > { %332 = sbr.rel (%p1329_p8) target bundleno = 703 (0x2bf), region = 44  ;;  %s1460_s24 = sand.u32 (!%p1329_p8), 1, %s1204_s28  }
  0x66   : > { %s825_s26 = sshll.u32 (!%p1329_p8), %s1460_s24, 3  ;;  %s335_s17 = scalar_lea.sflag (!%p1329_p8), [#allocation3], %s1460_s24 }
  0x67   : > { %s338_s25 = scalar_lea.vmem (!%p1329_p8), [#allocation2], %s825_s26  ;;  %p1648_p4 = scmp.ne.s32.totalorder (!%p1329_p8), %s1639_s13, 0 }
  0x6c   : > { %1183 = dma.done.wait (%p1648_p4), %s335_s17, 128  }
  0x6d   : > { %1185 = vsyncadd (%p1648_p4), %s335_s17, 4294967168  ;;  %p1649_p9 = scmp.eq.s32.totalorder %s1308_s11, 0 }
  0x6f   : > { %1187 = dma.done.wait (%p1649_p9), [#allocation6], 512   ;;  %p1650_p11 = pmov %p1649_p9 }
  0x70   : > { %vm391_vm0 = vcmask 261120   ;;  %v390_v0 = vld [vmem:[%s338_s25] sm:$0xff]  ;;  %v980_v7 = vld [vmem:[#allocation5] sm:$0xff]   ;;  %v1227_v9 = vmov 0.0   ;;  %v982_v10 = vld [vmem:[#allocation5 + $0x8] sm:$0xff]   ;;  %vm1228_vm1 = vmmov 0  }
  0x71   : > { %1189 = vsyncadd (%p1650_p11), [#allocation6], 4294966784  ;;  %v392_v1 = vsel %vm391_vm0, %v390_v0, 0.0  ;;  %v981_v8 = vld [vmem:[#allocation7] sm:$0xff]   ;;  %859 = vmatprep.subr.bf16.mxu0 %v1227_v9  ;;  %867 = vmatprep.subr.bf16.mxu1 %v1227_v9  ;;  %v983_v11 = vld [vmem:[#allocation7 + $0x8] sm:$0xff]   ;;  %s1493_s16 = sshll.u32 %s1460_s24, 2 }
  0x72   : > { %393 = vadd.xlane.f32.xlu0 %v392_v1  ;;  %860 = vmatpush3.bf16.msra.mxu0 %v980_v7  ;;  %v831_v16 = vld [vmem:[%s1623_s1] ss:$0 sm:$0xff]  ;;  %v985_v23 = vld [vmem:[%s1627_s5 + $0x8] sm:$0xff]   ;;  %s606_s26 = sand.u32 1, %s1308_s11   ;;  %s1497_s17 = sshll.u32 %s1212_s30, 6  ;;  %vm483_vm2 = vcmask 257024  }
  0x73   : > { %868 = vmatpush3.bf16.msra.mxu1 %v981_v8  ;;  %861 = vmatprep.subr.bf16.mxu0 %v1227_v9  ;;  %v832_v18 = vld [vmem:[%s1624_s2] ss:$0 sm:$0xff]  ;;  %s381_s25 = scalar_lea.vmem [#allocation9], %s1493_s16  ;;  %s374_s15 = scalar_lea.vmem [#allocation8], %s1493_s16 }
  0x74   : > { %869 = vmatprep.subr.bf16.mxu1 %v1227_v9  ;;  %863 = vmatprep.mubr.msk.bf16.mxu0 %vm1228_vm1, %v1227_v9  ;;  %v984_v21 = vld [vmem:[%s1627_s5] sm:$0xff]   ;;  %s640_s13 = sshll.u32 %s381_s25, 4  ;;  %s626_s19 = sshll.u32 %s374_s15, 4  ;;  %s1507_s13 = int_to_ptr.vmem [resolvable:$true] %s640_s13  ;;  %s1515_s19 = int_to_ptr.vmem [resolvable:$true] %s626_s19 }
  0x75   : > { %871 = vmatprep.mubr.msk.bf16.mxu1 %vm1228_vm1, %v1227_v9  ;;  %s1505_s23 = scalar_lea.hbm %s1629_s7, %s1497_s17  ;;  %s1513_s20 = scalar_lea.hbm %s1628_s6, %s1497_s17 }
  0x76   : > { %862 = vmatpush3.bf16.msra.mxu0 %v982_v10  ;;  %s1519_s21 = scalar_lea.sflag [#allocation10], %s606_s26  ;;  %s1074_s27 = scalar_lea.vmem %s1507_s13, 64 }
  0x77   : > { %870 = vmatpush3.bf16.msra.mxu1 %v983_v11  ;;  %875 = vmatprep.subr.bf16.mxu0 %v1227_v9  ;;  %p1075_p8 = scmp.ne.s32.totalorder %s1507_s13, %s1074_s27  ;;  %p1651_p2 = scmp.ne.s32.totalorder %s1645_s18, 0 }
  0x78   : > { %s1229_s12 = smov [#allocation9]  }
  0x79   : > { %p1076_p13 = pnand %p1075_p8, %p1651_p2  ;;  %s1078_s30 = sshll.u32 %s1229_s12, 4  ;;  %s1079_s30 = int_to_ptr.vmem [resolvable:$false] %s1078_s30 }
  0x7a   : > { %s1080_s11 = scalar_lea.vmem %s1079_s30, 128  ;;  %p1081_p7 = scmp.lt.s32.totalorder %s1507_s13, %s1079_s30 }
  0x7b   : > { %p1077_p5 = pneg %p1076_p13  ;;  %p1082_p12 = scmp.lt.s32.totalorder %s1080_s11, %s1074_s27 }
  0x7d   : > { %p1083_p0 = por %p1082_p12, %p1081_p7 }
  0x7f   : > { %p1084_p1 = pnand %p1083_p0, %p1077_p5 }
  0xff   : > { %v394_v2 = vpop.xlane.xlu0 %393 }
 0x100   : > { %v396_v3 = vmul.f32 0.03125, %v394_v2 }
 0x102   : > { %v397_v4 = vsub.f32 %v390_v0, %v396_v3 }
 0x104   : > { %v398_v5 = vmul.f32 %v397_v4, %v397_v4 }
 0x106   : > { %v399_v6 = vsel %vm391_vm0, %v398_v5, 0.0 }
 0x107   : > { %400 = vadd.xlane.f32.xlu0 %v399_v6 }
 0x194   : > { %v401_v12 = vpop.xlane.xlu0 %400 }
 0x195   : > { %v402_v13 = vmul.f32 0.03125, %v401_v12 }
 0x197   : > { %v403_v14 = vadd.f32 1e-05, %v402_v13 }
 0x199   : > { %986 = vrsqrt.f32 %v403_v14 }
 0x1a3   : > { %v987_v15 = vpop.eup %986 }
 0x1a4   : > { %v405_v17 = vmul.f32 %v987_v15, %v397_v4 }
 0x1a6   : > { %v413_v19 = vmul.f32 %v831_v16, %v405_v17 }
 0x1a8   : > { %v421_v20 = vadd.f32 %v832_v18, %v413_v19 }
 0x1aa   : > { %v422_v22 = vpack.c.bf16 %v421_v20, %v421_v20 }
 0x1ac   : > { %864 = vmatmul.mubr.msk.bf16.vlgmr.msra.gmra.mrb[0].mxu0 %vm391_vm0, %v422_v22  ;;  %872 = vmatmul.mubr.msk.bf16.vlgmr.msra.gmra.mrb[0].mxu1 %vm391_vm0, %v422_v22 }
 0x1ad   : > { %876 = vmatpush3.bf16.msra.mxu0 %v984_v21  ;;  %879 = vmatprep.mubr.msk.bf16.mxu0 %vm1228_vm1, %v1227_v9 }
 0x1ae   : > { %877 = vmatprep.subr.bf16.mxu0 %v1227_v9 }
 0x1b1   : > { %878 = vmatpush3.bf16.msra.mxu0 %v985_v23 }
 0x1b4   : > { %880 = vmatmul.mubr.msk.bf16.vlgmr.msra.gmra.mrb[4].mxu0 %vm391_vm0, %v422_v22 }
 0x27f   : > { %v476_v24 = vpop.f32.mrb[0].mxu0  ;;  %v535_v25 = vpop.f32.mrb[0].mxu1 }
 0x280   : > { %v482_v26 = vpack.c.bf16 %v476_v24, %v476_v24  ;;  %v541_v27 = vpack.c.bf16 %v535_v25, %v535_v25  ;;  %v865_v28 = vpop.f32.mrb[1].mxu0  ;;  %v873_v29 = vpop.f32.mrb[1].mxu1 }
 0x281   : > { %v479_v30 = vpop.f32.mrb[2].mxu0  ;;  %v538_v31 = vpop.f32.mrb[2].mxu1 }
 0x282   : > { %v866_v32 = vpop.f32.mrb[3].mxu0  ;;  %v874_v33 = vpop.f32.mrb[3].mxu1  ;;  %542 = vst.msk [vmem:[%s381_s25] sm:$0xf] %vm483_vm2, %v541_v27  ;;  %484 = vst.msk [vmem:[%s374_s15] sm:$0xf] %vm483_vm2, %v482_v26 }
 0x283   : > { %1087 = shalt.err (!%p1084_p1)
}
 0x284   : > { %s1088_s26 = scalar_lea.hbm %s1505_s23, 64  ;;  %s1092_s12 = scalar_lea.hbm %s1629_s7, 128 }
 0x285   : > { %p1089_p6 = scmp.ne.s32.totalorder %s1505_s23, %s1088_s26  ;;  %p1093_p4 = scmp.lt.u32.totalorder %s1505_s23, %s1629_s7 }
 0x286   : > { %p1094_p9 = scmp.lt.u32.totalorder %s1092_s12, %s1088_s26  ;;  %p1096_p8 = scmp.lt.u32.totalorder %s1088_s26, %s1505_s23 }
 0x287   : > { %p1090_p10 = pnand %p1089_p6, %p1651_p2 }
 0x288   : > { %p1095_p11 = por %p1094_p9, %p1093_p4 }
 0x289   : > { %p1091_p3 = pneg %p1090_p10 }
 0x28a   : > { %p1097_p13 = por %p1096_p8, %p1095_p11 }
 0x28c   : > { %p1098_p5 = pnand %p1097_p13, %p1091_p3 }
 0x28e   : > { %1101 = shalt.err (!%p1098_p5)
}
 0x28f   : > { %894 = dma.vmem_to_hbm [thread:$0]  (%p1651_p2), %s1507_s13, 64, %s1505_s23, %s1519_s21  }
 0x290   : > { %s602_s27 = scalar_lea.sflag [#allocation4], %s1460_s24  ;;  %s1102_s0 = scalar_lea.vmem %s1515_s19, 64 }
 0x291   : > { %p1103_p7 = scmp.ne.s32.totalorder %s1515_s19, %s1102_s0  ;;  %s1230_s11 = smov [#allocation8]  }
 0x292   : > { %s1106_s26 = sshll.u32 %s1230_s11, 4  ;;  %s1107_s26 = int_to_ptr.vmem [resolvable:$false] %s1106_s26 }
 0x293   : > { %p1104_p12 = pnand %p1103_p7, %p1651_p2  ;;  %s1108_s25 = scalar_lea.vmem %s1107_s26, 128 }
 0x294   : > { %p1109_p1 = scmp.lt.s32.totalorder %s1515_s19, %s1107_s26  ;;  %p1110_p6 = scmp.lt.s32.totalorder %s1108_s25, %s1102_s0 }
 0x295   : > { %p1105_p0 = pneg %p1104_p12 }
 0x296   : > { %p1111_p10 = por %p1110_p6, %p1109_p1 }
 0x298   : > { %p1112_p3 = pnand %p1111_p10, %p1105_p0 }
 0x29a   : > { %1115 = shalt.err (!%p1112_p3)
}
 0x29b   : > { %s1116_s24 = scalar_lea.hbm %s1513_s20, 64  ;;  %s1120_s15 = scalar_lea.hbm %s1628_s6, 128 }
 0x29c   : > { %p1117_p4 = scmp.ne.s32.totalorder %s1513_s20, %s1116_s24  ;;  %p1121_p8 = scmp.lt.u32.totalorder %s1513_s20, %s1628_s6 }
 0x29d   : > { %p1122_p13 = scmp.lt.u32.totalorder %s1120_s15, %s1116_s24  ;;  %p1124_p7 = scmp.lt.u32.totalorder %s1116_s24, %s1513_s20 }
 0x29e   : > { %p1118_p9 = pnand %p1117_p4, %p1651_p2 }
 0x29f   : > { %p1123_p5 = por %p1122_p13, %p1121_p8 }
 0x2a0   : > { %p1119_p11 = pneg %p1118_p9 }
 0x2a1   : > { %p1125_p12 = por %p1124_p7, %p1123_p5 }
 0x2a3   : > { %p1126_p0 = pnand %p1125_p12, %p1119_p11 }
 0x2a5   : > { %1129 = shalt.err (!%p1126_p0)
}
 0x2a6   : > { %893 = dma.vmem_to_hbm [thread:$0]  (%p1651_p2), %s1515_s19, 64, %s1513_s20, %s602_s27   ;;  %v593_v34 = vpop.f32.mrb[4].mxu0 }
 0x2a7   : > { %s388_s0 = scalar_lea.vmem [#allocation11], %s1493_s16  ;;  %v599_v35 = vpack.c.bf16 %v593_v34, %v593_v34  ;;  %v881_v36 = vpop.f32.mrb[5].mxu0  ;;  %s1570_s24 = scalar_lea.hbm %s1630_s8, %s1497_s17 }
 0x2a8   : > { %s654_s11 = sshll.u32 %s388_s0, 4  ;;  %v596_v37 = vpop.f32.mrb[6].mxu0  ;;  %s1231_s16 = smov [#allocation11]   ;;  %s1572_s11 = int_to_ptr.vmem [resolvable:$true] %s654_s11 }
 0x2a9   : > { %v882_v38 = vpop.f32.mrb[7].mxu0  ;;  %600 = vst.msk [vmem:[%s388_s0] sm:$0xf] %vm483_vm2, %v599_v35  ;;  %s1130_s19 = scalar_lea.vmem %s1572_s11, 64  ;;  %s1134_s20 = sshll.u32 %s1231_s16, 4  ;;  %s1135_s20 = int_to_ptr.vmem [resolvable:$false] %s1134_s20 }
 0x2aa   : > { %p1131_p1 = scmp.ne.s32.totalorder %s1572_s11, %s1130_s19  ;;  %s1136_s27 = scalar_lea.vmem %s1135_s20, 128 }
 0x2ab   : > { %p1137_p3 = scmp.lt.s32.totalorder %s1572_s11, %s1135_s20  ;;  %p1138_p4 = scmp.lt.s32.totalorder %s1136_s27, %s1130_s19 }
 0x2ac   : > { %p1132_p6 = pnand %p1131_p1, %p1651_p2 }
 0x2ad   : > { %p1139_p9 = por %p1138_p4, %p1137_p3 }
 0x2ae   : > { %p1133_p10 = pneg %p1132_p6 }
 0x2b0   : > { %p1140_p11 = pnand %p1139_p9, %p1133_p10 }
 0x2b2   : > { %1143 = shalt.err (!%p1140_p11)
}
 0x2b3   : > { %s1144_s17 = scalar_lea.hbm %s1570_s24, 64  ;;  %s1148_s15 = scalar_lea.hbm %s1630_s8, 128 }
 0x2b4   : > { %p1145_p8 = scmp.ne.s32.totalorder %s1570_s24, %s1144_s17  ;;  %p1149_p7 = scmp.lt.u32.totalorder %s1570_s24, %s1630_s8 }
 0x2b5   : > { %p1150_p12 = scmp.lt.u32.totalorder %s1148_s15, %s1144_s17  ;;  %p1152_p1 = scmp.lt.u32.totalorder %s1144_s17, %s1570_s24 }
 0x2b6   : > { %p1146_p13 = pnand %p1145_p8, %p1651_p2 }
 0x2b7   : > { %p1151_p0 = por %p1150_p12, %p1149_p7 }
 0x2b8   : > { %p1147_p5 = pneg %p1146_p13 }
 0x2b9   : > { %p1153_p6 = por %p1152_p1, %p1151_p0 }
 0x2bb   : > { %p1154_p10 = pnand %p1153_p6, %p1147_p5 }
 0x2bd   : > { %1157 = shalt.err (!%p1154_p10)
}
 0x2be   : > { %895 = dma.vmem_to_hbm [thread:$0]  (%p1651_p2), %s1572_s11, 64, %s1570_s24, %s1519_s21  }
 0x2bf PF: > { %s1652_s0 = sld [smem:[#allocation16_spill]]  ;;  %s1653_s26 = sld [smem:[#allocation17_spill]] }
 0x2c0   : > { %p1655_p4 = scmp.ge.s32.totalorder %s1220_s10, 2 }
 0x2c5   : > { %s666_s25 = sand.u32 1, %s1652_s0   ;;  %p1654_p3 = scmp.ne.s32.totalorder %s1653_s26, 0 }
 0x2c6   : > { %s667_s19 = scalar_lea.sflag [#allocation4], %s666_s25 }
 0x2c7   : > { %p911_p9 = pnand %p1655_p4, %p1654_p3 }
 0x2c9   : > { %1191 = dma.done.wait (!%p911_p9), %s667_s19, 64  }
 0x2ca   : > { %1193 = vsyncadd (!%p911_p9), %s667_s19, 4294967232  ;;  %s1656_s16 = sadd.s32 4294967294, %s1220_s10  }
 0x2cb   : > { %s675_s20 = sand.u32 1, %s1656_s16  }
 0x2cc   : > { %s676_s27 = scalar_lea.sflag [#allocation10], %s675_s20 }
 0x2cd   : > { %1195 = dma.done.wait (!%p911_p9), %s676_s27, 128  }
 0x2ce   : > { %1197 = vsyncadd (!%p911_p9), %s676_s27, 4294967168  ;;  %s29_s10 = sadd.s32 1, %s1220_s10   ;;  %s1657_s27 = smov %s1204_s28 }
 0x2cf   : > { %p26_p2 = scmp.ge.s32.totalorder %s29_s10, 4   ;;  %s1658_s28 = smov %s1208_s29 }
 0x2d0   : > { %s1659_s29 = smov %s1417_s22  ;;  %s1660_s30 = smov %s1216_s9 }
 0x2d1   : > { %s1661_s9 = smov %s1663_s14  ;;  %28 = sbr.rel (!%p26_p2) target bundleno = 11 (0xb), region = 129 }
 0x2d8   :  { %690 = vsyncpa [#allocation3], 1 }
 0x2d9   :  { %692 = vsyncpa [#allocation3 + $0x1], 1 }
 0x2da   :  { %693 = vsyncpa [#allocation6], 1 }
 0x2db   :  { %694 = vsyncpa [#allocation4], 1 }
 0x2dc   :  { %696 = vsyncpa [#allocation4 + $0x1], 1 }
 0x2dd   :  { %697 = vsyncpa [#allocation10], 1 }
 0x2de   :  { %699 = vsyncpa [#allocation10 + $0x1], 1 }

</bundles_post_ra>
